<compile_context>
chip_gen: v6e
topology: v6e:2x2x1
jax: 0.10.0
libtpu: 0.0.40
codegen_flags: <defaults>
</compile_context>

<pallas_src>
import jax
import jax.numpy as jnp
from jax.experimental import pallas as pl
from jax.experimental.pallas import tpu as pltpu


# ----------------------------------------------------------------------------
# Fused TextCNN forward kernel (conv bank + pool + ReLU + decoder per batch block).
# ----------------------------------------------------------------------------
def make_textcnn_kernel(b_blk, seq_len, k_max):
    def kernel(x_ref, w_ref, cb_ref, mask_ref, dw_ref, db_ref, o_ref):
        # x_ref   : (b_blk*T, 2E)   bf16   flattened activations for this batch block
        # w_ref   : (k_max, 2E, sumC) bf16 channel-packed conv weights (zero-padded taps)
        # cb_ref  : (1, sumC)       f32    packed conv bias
        # mask_ref: (T, sumC)       f32    0 where t < L_i for that channel group, else -1e30
        # dw_ref  : (sumC, 2)       f32    decoder weight (transposed)
        # db_ref  : (1, 2)          f32    decoder bias
        # o_ref   : (b_blk, 2)      f32
        x = x_ref[...]                                   # bf16, fed straight to the MXU
        R = b_blk * seq_len
        sum_c = w_ref.shape[-1]

        # One lane-dense matmul per tap over the whole block; accumulate in f32.
        acc = jnp.dot(x, w_ref[0], preferred_element_type=jnp.float32)      # (R, sumC)
        for tau in range(1, k_max):
            y = jnp.dot(x, w_ref[tau], preferred_element_type=jnp.float32)  # (R, sumC)
            # Output row r needs y[r + tau]; roll (XLU) instead of a sublane-misaligned
            # slice.  Rows that wrap past a sample boundary all have t >= L_i and are
            # masked to -inf below, and taps >= k_i contribute exact zeros for that group.
            acc = acc + pltpu.roll(y, shift=R - tau, axis=0)

        # Per-channel-group valid-length mask, then AdaptiveMaxPool1d(1) over time.
        acc3 = acc.reshape(b_blk, seq_len, sum_c) + mask_ref[...]
        pooled = jnp.max(acc3, axis=1) + cb_ref[...]     # bias is time-constant -> after max
        enc = jnp.maximum(pooled, 0.0)                   # ReLU; (b_blk, sumC) == decoder input

        # TODO(synk): nn.Dropout(0.5) is identity at inference; train mode would need
        #             pltpu.prng_seed + pltpu.stateful_bernoulli here.
        logits = (jnp.dot(enc, dw_ref[...], preferred_element_type=jnp.float32)
                  + db_ref[...])                         # (b_blk, 2)
        o_ref[...] = logits.astype(o_ref.dtype)

    return kernel


def textcnn_pallas(x2d, w_packed, conv_bias, mask, dec_w_t, dec_b, *,
                   batch, seq_len, b_blk=8):
    """x2d: (B*T, 2E) bf16; w_packed: (k_max, 2E, sumC) bf16; conv_bias: (1, sumC) f32;
       mask: (T, sumC) f32; dec_w_t: (sumC, 2) f32; dec_b: (1, 2) f32."""
    bt, e2 = x2d.shape
    k_max, _, sum_c = w_packed.shape
    assert bt == batch * seq_len
    assert batch % b_blk == 0, "batch must be a multiple of the batch block size"

    return pl.pallas_call(
        make_textcnn_kernel(b_blk, seq_len, k_max),
        out_shape=jax.ShapeDtypeStruct((batch, 2), jnp.float32),
        grid=(batch // b_blk,),
        in_specs=[
            pl.BlockSpec((b_blk * seq_len, e2), lambda i: (i, 0)),     # x streams per block
            pl.BlockSpec((k_max, e2, sum_c), lambda i: (0, 0, 0)),     # weights stay resident
            pl.BlockSpec((1, sum_c), lambda i: (0, 0)),
            pl.BlockSpec((seq_len, sum_c), lambda i: (0, 0)),
            pl.BlockSpec((sum_c, 2), lambda i: (0, 0)),
            pl.BlockSpec((1, 2), lambda i: (0, 0)),
        ],
        out_specs=pl.BlockSpec((b_blk, 2), lambda i: (i, 0)),
        compiler_params=pltpu.CompilerParams(
            dimension_semantics=("parallel",)),          # megacore-shardable on v7x
    )(x2d, w_packed, conv_bias, mask, dec_w_t, dec_b)


# ----------------------------------------------------------------------------
# Parameters (PyTorch-layout shapes), inference-time packing, and forward pass.
# ----------------------------------------------------------------------------
def init_params(key, vocab_size, embed_size, kernel_sizes, channel_sizes):
    n = len(kernel_sizes)
    keys = iter(jax.random.split(key, 2 + 2 * n + 2))
    params = {
        "embedding": jax.random.normal(next(keys), (vocab_size, embed_size), jnp.float32),
        "constant_embedding": jax.random.normal(next(keys), (vocab_size, embed_size),
                                                jnp.float32),
        "conv_w": [],
        "conv_b": [],
    }
    in_ch = 2 * embed_size
    for k, c in zip(kernel_sizes, channel_sizes):
        bound = float((in_ch * k) ** -0.5)
        params["conv_w"].append(jax.random.uniform(next(keys), (c, in_ch, k),
                                                   jnp.float32, -bound, bound))
        params["conv_b"].append(jax.random.uniform(next(keys), (c,),
                                                   jnp.float32, -bound, bound))
    dsum = int(sum(channel_sizes))
    dbound = float(dsum ** -0.5)
    params["dec_w"] = jax.random.uniform(next(keys), (2, dsum), jnp.float32, -dbound, dbound)
    params["dec_b"] = jax.random.uniform(next(keys), (2,), jnp.float32, -dbound, dbound)
    return params


def prepare_inference_params(params, seq_len):
    """One-time packing of PyTorch-layout params into kernel-friendly layouts."""
    kernel_sizes = [int(w.shape[-1]) for w in params["conv_w"]]
    channels = [int(w.shape[0]) for w in params["conv_w"]]
    assert seq_len >= max(kernel_sizes), "sequence shorter than largest conv kernel"
    k_max = max(kernel_sizes)
    in_ch = int(params["conv_w"][0].shape[1])
    sum_c = int(sum(channels))

    # Pre-concatenated bf16 table: one gather yields lane-dense (B, T, 2E) directly.
    table = jnp.concatenate([params["embedding"], params["constant_embedding"]],
                            axis=-1).astype(jnp.bfloat16)

    # Channel-packed conv weights (k_max, 2E, sumC); taps >= k_i are zero for group i.
    w_packed = jnp.zeros((k_max, in_ch, sum_c), jnp.float32)
    c0 = 0
    for w, k, c in zip(params["conv_w"], kernel_sizes, channels):
        w_t = jnp.transpose(w, (2, 1, 0))                    # (k, 2E, C)
        w_packed = w_packed.at[:k, :, c0:c0 + c].set(w_t)
        c0 += c
    w_packed = w_packed.astype(jnp.bfloat16)

    conv_bias = jnp.concatenate(params["conv_b"]).reshape(1, sum_c).astype(jnp.float32)

    # Additive mask: each conv keeps its OWN valid length L_i = T - k_i + 1.
    neg = jnp.float32(-1e30)
    t_idx = jnp.arange(seq_len)[:, None]
    cols = []
    for k, c in zip(kernel_sizes, channels):
        l_i = seq_len - k + 1
        cols.append(jnp.broadcast_to(jnp.where(t_idx < l_i, 0.0, neg), (seq_len, c)))
    mask = jnp.concatenate(cols, axis=1).astype(jnp.float32)  # (T, sumC)

    dec_w_t = params["dec_w"].T.astype(jnp.float32)           # (sumC, 2)
    dec_b = params["dec_b"].reshape(1, 2).astype(jnp.float32)
    return {"table": table, "w_packed": w_packed, "conv_bias": conv_bias,
            "mask": mask, "dec_w_t": dec_w_t, "dec_b": dec_b}


def textcnn_forward(infer_params, token_ids, *, b_blk=8):
    b, t = token_ids.shape
    # Single gather from the pre-concatenated bf16 table; flatten outside the kernel.
    # TODO(synk): at production vocab sizes, move the gather in-kernel via
    #             PrefetchScalarGridSpec scalar-prefetched token ids + manual DMA.
    x = infer_params["table"][token_ids]                      # (B, T, 2E) bf16
    x2d = x.reshape(b * t, x.shape[-1])                       # (B*T, 2E)
    return textcnn_pallas(x2d, infer_params["w_packed"], infer_params["conv_bias"],
                          infer_params["mask"], infer_params["dec_w_t"],
                          infer_params["dec_b"], batch=b, seq_len=t, b_blk=b_blk)


# ----------------------------------------------------------------------------
# Pure-JAX reference (independent formulation).  It uses the same bf16-rounded
# embeddings / conv weights the kernel consumes (bf16 x bf16 MXU products are exact
# in f32), so the comparison isolates kernel math rather than quantization choice.
# ----------------------------------------------------------------------------
def textcnn_reference(params, token_ids):
    rnd = lambda a: a.astype(jnp.bfloat16).astype(jnp.float32)
    emb = rnd(params["embedding"])[token_ids]
    cemb = rnd(params["constant_embedding"])[token_ids]
    x = jnp.concatenate([emb, cemb], axis=-1)                 # (B, T, 2E)
    x_ncw = jnp.transpose(x, (0, 2, 1))                       # (B, 2E, T)
    seq_len = x.shape[1]

    feats = []
    for w, b in zip(params["conv_w"], params["conv_b"]):      # w: (C, 2E, k), b: (C,)
        w = rnd(w)
        k = w.shape[-1]
        l_i = seq_len - k + 1
        ys = []
        for t in range(l_i):
            window = x_ncw[:, :, t:t + k]                     # (B, 2E, k)
            ys.append(jnp.einsum("bek,cek->bc", window, w))
        y = jnp.stack(ys, axis=-1) + b[None, :, None]         # (B, C, L)
        pooled = jnp.max(y, axis=-1)                          # AdaptiveMaxPool1d(1) + squeeze
        feats.append(jnp.maximum(pooled, 0.0))                # ReLU
    enc = jnp.concatenate(feats, axis=-1)                     # (B, sumC)
    return enc @ params["dec_w"].T + params["dec_b"][None, :]


if __name__ == "__main__":
    vocab_size, embed_size = 50, 32
    kernel_sizes = (3, 5)
    channel_sizes = (64, 64)        # sumC = 128 -> lane-dense packed conv output
    batch, seq_len = 16, 16         # grid=(2,) over batch blocks of 8 (pipelined, parallel)

    key = jax.random.PRNGKey(0)
    k_param, k_tok = jax.random.split(key)
    params = init_params(k_param, vocab_size, embed_size, kernel_sizes, channel_sizes)
    token_ids = jax.random.randint(k_tok, (batch, seq_len), 0, vocab_size, dtype=jnp.int32)

    infer_params = prepare_inference_params(params, seq_len)
    out = jax.block_until_ready(jax.jit(textcnn_forward)(infer_params, token_ids))
    assert out.shape == (batch, 2), out.shape

    ref = jax.block_until_ready(textcnn_reference(params, token_ids))
    assert jnp.allclose(out, ref, atol=2e-3, rtol=2e-3), (out, ref)

    print("KERNEL_OK")
</pallas_src>

<mosaic_0001>
module attributes {stable_mosaic.version = 11 : i64} {
  func.func @kernel(%arg0: i32, %arg1: memref<128x64xbf16, #tpu.memory_space<vmem>>, %arg2: memref<5x64x128xbf16, #tpu.memory_space<vmem>>, %arg3: memref<1x128xf32, #tpu.memory_space<vmem>>, %arg4: memref<16x128xf32, #tpu.memory_space<vmem>>, %arg5: memref<128x2xf32, #tpu.memory_space<vmem>>, %arg6: memref<1x2xf32, #tpu.memory_space<vmem>>, %arg7: memref<8x2xf32, #tpu.memory_space<vmem>>) attributes {dimension_semantics = [#tpu.dimension_semantics<parallel>], iteration_bounds = array<i64: 2>, scalar_prefetch = 0 : i64, scratch_operands = 0 : i64, tpu.core_type = #tpu.core_type<tc>, window_params = [{transform_indices = @transform_0, window_bounds = array<i64: 128, 64>}, {pipeline_mode = #tpu.pipeline_mode<synchronous>, transform_indices = @transform_1, window_bounds = array<i64: 5, 64, 128>}, {pipeline_mode = #tpu.pipeline_mode<synchronous>, transform_indices = @transform_2, window_bounds = array<i64: 1, 128>}, {pipeline_mode = #tpu.pipeline_mode<synchronous>, transform_indices = @transform_3, window_bounds = array<i64: 16, 128>}, {pipeline_mode = #tpu.pipeline_mode<synchronous>, transform_indices = @transform_4, window_bounds = array<i64: 128, 2>}, {pipeline_mode = #tpu.pipeline_mode<synchronous>, transform_indices = @transform_5, window_bounds = array<i64: 1, 2>}, {transform_indices = @transform_6, window_bounds = array<i64: 8, 2>}]} {
    %c0 = arith.constant 0 : index
    %c0_0 = arith.constant 0 : index
    %0 = vector.load %arg1[%c0, %c0_0] : memref<128x64xbf16, #tpu.memory_space<vmem>>, vector<128x64xbf16>
    %c0_1 = arith.constant 0 : index
    %c0_2 = arith.constant 0 : index
    %c0_3 = arith.constant 0 : index
    %1 = vector.load %arg2[%c0_1, %c0_2, %c0_3] : memref<5x64x128xbf16, #tpu.memory_space<vmem>>, vector<1x64x128xbf16>
    %2 = vector.shape_cast %1 : vector<1x64x128xbf16> to vector<64x128xbf16>
    %cst = arith.constant dense<0.000000e+00> : vector<128x128xf32>
    %3 = tpu.matmul %0, %2, %cst {dimension_numbers = #tpu.dot_dimension_numbers<[1], [0], [0], [1], [0, 0, 1, 1], [], []>} : vector<128x64xbf16>, vector<64x128xbf16>, vector<128x128xf32> -> vector<128x128xf32>
    %c1 = arith.constant 1 : index
    %c0_4 = arith.constant 0 : index
    %c0_5 = arith.constant 0 : index
    %4 = vector.load %arg2[%c1, %c0_4, %c0_5] : memref<5x64x128xbf16, #tpu.memory_space<vmem>>, vector<1x64x128xbf16>
    %5 = vector.shape_cast %4 : vector<1x64x128xbf16> to vector<64x128xbf16>
    %cst_6 = arith.constant dense<0.000000e+00> : vector<128x128xf32>
    %6 = tpu.matmul %0, %5, %cst_6 {dimension_numbers = #tpu.dot_dimension_numbers<[1], [0], [0], [1], [0, 0, 1, 1], [], []>} : vector<128x64xbf16>, vector<64x128xbf16>, vector<128x128xf32> -> vector<128x128xf32>
    %c127_i32 = arith.constant 127 : i32
    %7 = tpu.dynamic_rotate %6 by %c127_i32 dim 0 : vector<128x128xf32>, i32 -> vector<128x128xf32>
    %8 = arith.addf %3, %7 : vector<128x128xf32>
    %c2 = arith.constant 2 : index
    %c0_7 = arith.constant 0 : index
    %c0_8 = arith.constant 0 : index
    %9 = vector.load %arg2[%c2, %c0_7, %c0_8] : memref<5x64x128xbf16, #tpu.memory_space<vmem>>, vector<1x64x128xbf16>
    %10 = vector.shape_cast %9 : vector<1x64x128xbf16> to vector<64x128xbf16>
    %cst_9 = arith.constant dense<0.000000e+00> : vector<128x128xf32>
    %11 = tpu.matmul %0, %10, %cst_9 {dimension_numbers = #tpu.dot_dimension_numbers<[1], [0], [0], [1], [0, 0, 1, 1], [], []>} : vector<128x64xbf16>, vector<64x128xbf16>, vector<128x128xf32> -> vector<128x128xf32>
    %c126_i32 = arith.constant 126 : i32
    %12 = tpu.dynamic_rotate %11 by %c126_i32 dim 0 : vector<128x128xf32>, i32 -> vector<128x128xf32>
    %13 = arith.addf %8, %12 : vector<128x128xf32>
    %c3 = arith.constant 3 : index
    %c0_10 = arith.constant 0 : index
    %c0_11 = arith.constant 0 : index
    %14 = vector.load %arg2[%c3, %c0_10, %c0_11] : memref<5x64x128xbf16, #tpu.memory_space<vmem>>, vector<1x64x128xbf16>
    %15 = vector.shape_cast %14 : vector<1x64x128xbf16> to vector<64x128xbf16>
    %cst_12 = arith.constant dense<0.000000e+00> : vector<128x128xf32>
    %16 = tpu.matmul %0, %15, %cst_12 {dimension_numbers = #tpu.dot_dimension_numbers<[1], [0], [0], [1], [0, 0, 1, 1], [], []>} : vector<128x64xbf16>, vector<64x128xbf16>, vector<128x128xf32> -> vector<128x128xf32>
    %c125_i32 = arith.constant 125 : i32
    %17 = tpu.dynamic_rotate %16 by %c125_i32 dim 0 : vector<128x128xf32>, i32 -> vector<128x128xf32>
    %18 = arith.addf %13, %17 : vector<128x128xf32>
    %c4 = arith.constant 4 : index
    %c0_13 = arith.constant 0 : index
    %c0_14 = arith.constant 0 : index
    %19 = vector.load %arg2[%c4, %c0_13, %c0_14] : memref<5x64x128xbf16, #tpu.memory_space<vmem>>, vector<1x64x128xbf16>
    %20 = vector.shape_cast %19 : vector<1x64x128xbf16> to vector<64x128xbf16>
    %cst_15 = arith.constant dense<0.000000e+00> : vector<128x128xf32>
    %21 = tpu.matmul %0, %20, %cst_15 {dimension_numbers = #tpu.dot_dimension_numbers<[1], [0], [0], [1], [0, 0, 1, 1], [], []>} : vector<128x64xbf16>, vector<64x128xbf16>, vector<128x128xf32> -> vector<128x128xf32>
    %c124_i32 = arith.constant 124 : i32
    %22 = tpu.dynamic_rotate %21 by %c124_i32 dim 0 : vector<128x128xf32>, i32 -> vector<128x128xf32>
    %23 = arith.addf %18, %22 : vector<128x128xf32>
    %24 = vector.shape_cast %23 : vector<128x128xf32> to vector<8x16x128xf32>
    %c0_16 = arith.constant 0 : index
    %c0_17 = arith.constant 0 : index
    %25 = vector.load %arg4[%c0_16, %c0_17] : memref<16x128xf32, #tpu.memory_space<vmem>>, vector<16x128xf32>
    %26 = vector.shape_cast %25 : vector<16x128xf32> to vector<1x16x128xf32>
    %27 = vector.broadcast %26 : vector<1x16x128xf32> to vector<8x16x128xf32>
    %28 = arith.addf %24, %27 : vector<8x16x128xf32>
    %cst_18 = arith.constant dense<0xFF800000> : vector<8x128xf32>
    %29 = vector.multi_reduction <maximumf>, %28, %cst_18 [1] : vector<8x16x128xf32> to vector<8x128xf32>
    %c0_19 = arith.constant 0 : index
    %c0_20 = arith.constant 0 : index
    %30 = vector.load %arg3[%c0_19, %c0_20] : memref<1x128xf32, #tpu.memory_space<vmem>>, vector<1x128xf32>
    %31 = vector.broadcast %30 : vector<1x128xf32> to vector<8x128xf32>
    %32 = arith.addf %29, %31 : vector<8x128xf32>
    %cst_21 = arith.constant 0.000000e+00 : f32
    %33 = vector.broadcast %cst_21 : f32 to vector<8x128xf32>
    %34 = arith.maximumf %32, %33 : vector<8x128xf32>
    %c0_22 = arith.constant 0 : index
    %c0_23 = arith.constant 0 : index
    %35 = vector.load %arg5[%c0_22, %c0_23] : memref<128x2xf32, #tpu.memory_space<vmem>>, vector<128x2xf32>
    %cst_24 = arith.constant dense<0.000000e+00> : vector<8x2xf32>
    %36 = tpu.matmul %34, %35, %cst_24 {dimension_numbers = #tpu.dot_dimension_numbers<[1], [0], [0], [1], [0, 0, 1, 1], [], []>} : vector<8x128xf32>, vector<128x2xf32>, vector<8x2xf32> -> vector<8x2xf32>
    %c0_25 = arith.constant 0 : index
    %c0_26 = arith.constant 0 : index
    %37 = vector.load %arg6[%c0_25, %c0_26] : memref<1x2xf32, #tpu.memory_space<vmem>>, vector<1x2xf32>
    %38 = vector.broadcast %37 : vector<1x2xf32> to vector<8x2xf32>
    %39 = arith.addf %36, %38 : vector<8x2xf32>
    %c0_27 = arith.constant 0 : index
    %c0_28 = arith.constant 0 : index
    %40 = vector.load %arg7[%c0_27, %c0_28] : memref<8x2xf32, #tpu.memory_space<vmem>>, vector<8x2xf32>
    tpu.vector_store %arg7[%c0_27, %c0_28], %39 {strides = array<i32>} : memref<8x2xf32, #tpu.memory_space<vmem>>, vector<8x2xf32>,
    return
  }
  func.func @transform_0(%arg0: i32) -> (i32, i32) {
    %c0_i32 = arith.constant 0 : i32
    %c0_i32_0 = arith.constant 0 : i32
    return %arg0, %c0_i32 : i32, i32
  }
  func.func @transform_1(%arg0: i32) -> (i32, i32, i32) {
    %c0_i32 = arith.constant 0 : i32
    %c0_i32_0 = arith.constant 0 : i32
    %c0_i32_1 = arith.constant 0 : i32
    %c0_i32_2 = arith.constant 0 : i32
    return %c0_i32, %c0_i32_0, %c0_i32_1 : i32, i32, i32
  }
  func.func @transform_2(%arg0: i32) -> (i32, i32) {
    %c0_i32 = arith.constant 0 : i32
    %c0_i32_0 = arith.constant 0 : i32
    %c0_i32_1 = arith.constant 0 : i32
    return %c0_i32, %c0_i32_0 : i32, i32
  }
  func.func @transform_3(%arg0: i32) -> (i32, i32) {
    %c0_i32 = arith.constant 0 : i32
    %c0_i32_0 = arith.constant 0 : i32
    %c0_i32_1 = arith.constant 0 : i32
    return %c0_i32, %c0_i32_0 : i32, i32
  }
  func.func @transform_4(%arg0: i32) -> (i32, i32) {
    %c0_i32 = arith.constant 0 : i32
    %c0_i32_0 = arith.constant 0 : i32
    %c0_i32_1 = arith.constant 0 : i32
    return %c0_i32, %c0_i32_0 : i32, i32
  }
  func.func @transform_5(%arg0: i32) -> (i32, i32) {
    %c0_i32 = arith.constant 0 : i32
    %c0_i32_0 = arith.constant 0 : i32
    %c0_i32_1 = arith.constant 0 : i32
    return %c0_i32, %c0_i32_0 : i32, i32
  }
  func.func @transform_6(%arg0: i32) -> (i32, i32) {
    %c0_i32 = arith.constant 0 : i32
    %c0_i32_0 = arith.constant 0 : i32
    return %arg0, %c0_i32 : i32, i32
  }
}

</mosaic_0001>

<bundles_post_ra>
// kernel: textcnn_forward.1
= control target key start
LH: loop header
LB: loop body
LE: loop exit
PB: predicated region body
PF: predicated region fallthrough
CT: control target
= control target key end

     0   :  { %s1875_s21 = smov 0   ;;  %s2479_s0 = inlined_call_operand.vmem [shape: bf16[256,64], index: 0, kind: input, shape index: {}]   ;;  %s2480_s1 = inlined_call_operand.vmem [shape: bf16[5,64,128], index: 1, kind: input, shape index: {}]   ;;  %s2481_s2 = inlined_call_operand.vmem [shape: f32[1,128], index: 2, kind: input, shape index: {}]   ;;  %s2482_s3 = inlined_call_operand.vmem [shape: f32[16,128], index: 3, kind: input, shape index: {}]   ;;  %s2483_s4 = inlined_call_operand.vmem [shape: f32[128,2], index: 4, kind: input, shape index: {}]   ;;  %s2484_s5 = inlined_call_operand.vmem [shape: f32[1,2], index: 5, kind: input, shape index: {}]   ;;  %s2485_s6 = inlined_call_operand.vmem [shape: f32[16,2], index: 6, kind: output, shape index: {}]  }
   0x1 LB: > { %s1881_s22 = sadd.s32 4294967295, %s1836_s21   ;;  %p1444_p0 = scmp.ge.s32.totalorder %s1836_s21, 1  ;;  %s1836_s21 = sphi %s1875_s21, %s16_s21  }
   0x2   : > { %p213_p1 = scmp.lt.s32.totalorder %s1836_s21, 3 }
   0x4   : > { %p214_p2 = pnand %p1444_p0, %p213_p1 }
   0x5   : > { %s1445_s25 = sshll.u32 (!%p214_p2), %s1881_s22, 4  ;;  %p248_p4 = scmp.lt.s32.totalorder (!%p214_p2), %s1881_s22, 1 }
   0x6   : > { %217 = sbr.rel (%p214_p2) target bundleno = 536 (0x218), region = 44  ;;  %p243_p3 = scmp.lt.s32.totalorder (!%p214_p2), %s1445_s25, 31 }
   0xb   : > { %v1802_v0 = vld [vmem:[%s2480_s1 + $0x38] sm:$0xff]   ;;  %v1803_v1 = vld [vmem:[%s2480_s1 + $0x30] sm:$0xff]   ;;  %s2487_s25 = smov (!%p243_p3, %s1445_s25), 31  ;;  %v1804_v2 = vld [vmem:[%s2480_s1 + $0x28] sm:$0xff]   ;;  %vm350_vm0 = vcmask 523264   ;;  %v1838_v28 = vmov 0.0   ;;  %v488_v45 = vlaneseq }
   0xc   : > { %1629 = vmatprep.subr.bf16.mxu0 %v1802_v0  ;;  %1784 = vmatprep.subr.bf16.mxu1 %v1802_v0  ;;  %s1446_s30 = sshll.u32 %s2487_s25, 2  ;;  %v1805_v3 = vld [vmem:[%s2480_s1 + $0x20] sm:$0xff]   ;;  %v1810_v6 = vld [vmem:[%s2480_s1 + $0x18] sm:$0xff]   ;;  %v1812_v10 = vld [vmem:[%s2480_s1 + $0x10] sm:$0xff]   ;;  %vm1839_vm1 = vmmov 0   ;;  %vm1294_vm6 = vcmask 1041409  }
   0xd   : > { %1630 = vmatpush3.bf16.msra.mxu0 %v1802_v0  ;;  %1788 = vmatpush3.bf16.msra.mxu1 %v1802_v0  ;;  %s1901_s11 = scalar_lea.vmem %s2479_s0, %s1446_s30  ;;  %v1811_v7 = vld [vmem:[%s2480_s1 + $0x58] sm:$0xff]   ;;  %v1813_v11 = vld [vmem:[%s2480_s1 + $0x50] sm:$0xff]   ;;  %v1818_v14 = vld [vmem:[%s2480_s1 + $0x8] sm:$0xff]   ;;  %v2105_v48 = vshrl.u32 %v488_v45, 7  ;;  %vm1297_vm7 = vcmask 1042434   ;;  %vm1300_vm8 = vcmask 1043459  }
   0xe   : > { %1631 = vmatprep.subr.bf16.mxu0 %v1803_v1  ;;  %1785 = vmatprep.subr.bf16.mxu1 %v1803_v1  ;;  %v1904_v4 = vld [vmem:[%s1901_s11] sm:$0xff]   ;;  %v1920_v8 = vld [vmem:[%s1901_s11 + $0x8] sm:$0xff]   ;;  %v1932_v12 = vld [vmem:[%s1901_s11 + $0x10] sm:$0xff]   ;;  %vm1303_vm9 = vcmask 1044484   ;;  %vm1306_vm10 = vcmask 1045509   ;;  %vm1309_vm11 = vcmask 1046534  }
   0xf   : > { %v1907_v5 = vld [vmem:[%s1901_s11 + $0x20] sm:$0xff]   ;;  %1637 = vmatprep.mubr.msk.bf16.mxu0 %vm350_vm0, %v1904_v4  ;;  %v1923_v9 = vld [vmem:[%s1901_s11 + $0x28] sm:$0xff]   ;;  %v1935_v13 = vld [vmem:[%s1901_s11 + $0x30] sm:$0xff]   ;;  %vm490_vm2 = vcmp.lt.s32.totalorder %v2105_v48, 7  ;;  %vm774_vm3 = vcmp.lt.s32.totalorder %v2105_v48, 6  ;;  %vm953_vm4 = vcmp.lt.s32.totalorder %v2105_v48, 5 }
  0x10   : > { %1645 = vmatprep.mubr.msk.bf16.mxu1 %vm350_vm0, %v1907_v5  ;;  %v1819_v15 = vld [vmem:[%s2480_s1 + $0x48] sm:$0xff]   ;;  %v1952_v16 = vld [vmem:[%s1901_s11 + $0x18] sm:$0xff]   ;;  %v1820_v18 = vld [vmem:[%s2480_s1] sm:$0xff]   ;;  %vm1132_vm5 = vcmp.lt.s32.totalorder %v2105_v48, 4  ;;  %vm1312_vm12 = vcmask 1047559   ;;  %s2489_s22 = smov (!%p248_p4, %s1881_s22), 1 }
  0x11   : > { %1632 = vmatpush3.bf16.msra.mxu0 %v1803_v1  ;;  %1789 = vmatpush3.bf16.msra.mxu1 %v1803_v1  ;;  %v1955_v17 = vld [vmem:[%s1901_s11 + $0x38] sm:$0xff]   ;;  %v1821_v19 = vld [vmem:[%s2480_s1 + $0x40] sm:$0xff]   ;;  %v1824_v22 = vld [vmem:[%s2480_s1 + $0x70] sm:$0xff]   ;;  %s1447_s16 = sshll.u32 %s2489_s22, 3  ;;  %vm1385_vm13 = vcmask 15360  }
  0x12   : > { %1633 = vmatprep.subr.bf16.mxu0 %v1804_v2  ;;  %1786 = vmatprep.subr.bf16.mxu1 %v1804_v2  ;;  %v1822_v20 = vld [vmem:[%s2480_s1 + $0x78] sm:$0xff]   ;;  %v1825_v23 = vld [vmem:[%s2480_s1 + $0x90] sm:$0xff]   ;;  %v1826_v24 = vld [vmem:[%s2480_s1 + $0x68] sm:$0xff]   ;;  %s251_s23 = scalar_lea.vmem %s2485_s6, %s1447_s16 }
  0x13   : > { %v1823_v21 = vld [vmem:[%s2480_s1 + $0x98] sm:$0xff]   ;;  %v1827_v25 = vld [vmem:[%s2480_s1 + $0x88] sm:$0xff]   ;;  %v1828_v26 = vld [vmem:[%s2480_s1 + $0x60] sm:$0xff]  }
  0x14   : > { %v1829_v27 = vld [vmem:[%s2480_s1 + $0x80] sm:$0xff]   ;;  %v1277_v29 = vld [vmem:[%s2483_s4 + $0x78] sm:$0xff]  ;;  %v1276_v30 = vld [vmem:[%s2483_s4 + $0x70] sm:$0xff] }
  0x15   : > { %1634 = vmatpush3.bf16.msra.mxu0 %v1804_v2  ;;  %1790 = vmatpush3.bf16.msra.mxu1 %v1804_v2  ;;  %v1275_v31 = vld [vmem:[%s2483_s4 + $0x68] sm:$0xff]  ;;  %v1274_v32 = vld [vmem:[%s2483_s4 + $0x60] sm:$0xff]  ;;  %v1273_v33 = vld [vmem:[%s2483_s4 + $0x58] sm:$0xff] }
  0x16   : > { %1635 = vmatprep.subr.bf16.mxu0 %v1805_v3  ;;  %1787 = vmatprep.subr.bf16.mxu1 %v1805_v3  ;;  %v1272_v34 = vld [vmem:[%s2483_s4 + $0x50] sm:$0xff]  ;;  %v1271_v35 = vld [vmem:[%s2483_s4 + $0x48] sm:$0xff]  ;;  %v1270_v36 = vld [vmem:[%s2483_s4 + $0x40] sm:$0xff] }
  0x17   : > { %v1269_v37 = vld [vmem:[%s2483_s4 + $0x38] sm:$0xff]  ;;  %v1268_v38 = vld [vmem:[%s2483_s4 + $0x30] sm:$0xff]  ;;  %v1267_v39 = vld [vmem:[%s2483_s4 + $0x28] sm:$0xff] }
  0x18   : > { %v1266_v40 = vld [vmem:[%s2483_s4 + $0x20] sm:$0xff]  ;;  %v1265_v41 = vld [vmem:[%s2483_s4 + $0x18] sm:$0xff]  ;;  %v1264_v42 = vld [vmem:[%s2483_s4 + $0x10] sm:$0xff] }
  0x19   : > { %1636 = vmatpush3.bf16.msra.mxu0 %v1805_v3  ;;  %1791 = vmatpush3.bf16.msra.mxu1 %v1805_v3  ;;  %v1263_v43 = vld [vmem:[%s2483_s4 + $0x8] sm:$0xff]  ;;  %v1262_v44 = vld [vmem:[%s2483_s4] sm:$0xff] }
  0x1a   : > { %1653 = vmatprep.subr.bf16.mxu1 %v1810_v6  ;;  %1677 = vmatprep.subr.bf16.mxu0 %v1811_v7 }
  0x1c   : > { %1638 = vmatmul.mubr.msk.bf16.vlgmr.msra.gmra.mxu0 %vm350_vm0, %v1920_v8  ;;  %1646 = vmatmul.mubr.msk.bf16.vlgmr.msra.gmra.mxu1 %vm350_vm0, %v1923_v9 }
  0x1d   : > { %1654 = vmatpush3.bf16.msra.mxu1 %v1810_v6  ;;  %1678 = vmatpush3.bf16.msra.mxu0 %v1811_v7 }
  0x1e   : > { %1655 = vmatprep.subr.bf16.mxu1 %v1812_v10  ;;  %1679 = vmatprep.subr.bf16.mxu0 %v1813_v11 }
  0x1f   : > { %1641 = vmatprep.mubr.msk.bf16.mxu0 %vm350_vm0, %v1932_v12  ;;  %1649 = vmatprep.mubr.msk.bf16.mxu1 %vm350_vm0, %v1935_v13 }
  0x21   : > { %1656 = vmatpush3.bf16.msra.mxu1 %v1812_v10  ;;  %1680 = vmatpush3.bf16.msra.mxu0 %v1813_v11 }
  0x22   : > { %1657 = vmatprep.subr.bf16.mxu1 %v1818_v14  ;;  %1681 = vmatprep.subr.bf16.mxu0 %v1819_v15 }
  0x24   : > { %1642 = vmatmul.mubr.msk.bf16.gmra.mxu0 %vm350_vm0, %v1952_v16  ;;  %1650 = vmatmul.mubr.msk.bf16.gmra.mxu1 %vm350_vm0, %v1955_v17 }
  0x25   : > { %1658 = vmatpush3.bf16.msra.mxu1 %v1818_v14  ;;  %1682 = vmatpush3.bf16.msra.mxu0 %v1819_v15 }
  0x26   : > { %1659 = vmatprep.subr.bf16.mxu1 %v1820_v18  ;;  %1683 = vmatprep.subr.bf16.mxu0 %v1821_v19 }
  0x27   : > { %1661 = vmatprep.mubr.msk.bf16.mxu1 %vm350_vm0, %v1904_v4  ;;  %1685 = vmatprep.mubr.msk.bf16.mxu0 %vm350_vm0, %v1904_v4 }
  0x29   : > { %1660 = vmatpush3.bf16.msra.mxu1 %v1820_v18  ;;  %1684 = vmatpush3.bf16.msra.mxu0 %v1821_v19 }
  0x2a   : > { %1701 = vmatprep.subr.bf16.mxu1 %v1822_v20  ;;  %1725 = vmatprep.subr.bf16.mxu0 %v1823_v21 }
  0x2c   : > { %1662 = vmatmul.mubr.msk.bf16.vlgmr.msra.gmra.mxu1 %vm350_vm0, %v1920_v8  ;;  %1686 = vmatmul.mubr.msk.bf16.vlgmr.msra.gmra.mxu0 %vm350_vm0, %v1920_v8 }
  0x2d   : > { %1702 = vmatpush3.bf16.msra.mxu1 %v1822_v20  ;;  %1726 = vmatpush3.bf16.msra.mxu0 %v1823_v21 }
  0x2e   : > { %1665 = vmatprep.mubr.msk.bf16.mxu1 %vm350_vm0, %v1932_v12  ;;  %1689 = vmatprep.mubr.msk.bf16.mxu0 %vm350_vm0, %v1932_v12 }
  0x2f   : > { %1703 = vmatprep.subr.bf16.mxu1 %v1824_v22  ;;  %1727 = vmatprep.subr.bf16.mxu0 %v1825_v23 }
  0x31   : > { %1704 = vmatpush3.bf16.msra.mxu1 %v1824_v22  ;;  %1728 = vmatpush3.bf16.msra.mxu0 %v1825_v23 }
  0x32   : > { %1705 = vmatprep.subr.bf16.mxu1 %v1826_v24  ;;  %1729 = vmatprep.subr.bf16.mxu0 %v1827_v25 }
  0x34   : > { %1666 = vmatmul.mubr.msk.bf16.gmra.mxu1 %vm350_vm0, %v1952_v16  ;;  %1690 = vmatmul.mubr.msk.bf16.gmra.mxu0 %vm350_vm0, %v1952_v16 }
  0x35   : > { %1669 = vmatprep.mubr.msk.bf16.mxu1 %vm350_vm0, %v1907_v5  ;;  %1693 = vmatprep.mubr.msk.bf16.mxu0 %vm350_vm0, %v1907_v5 }
  0x36   : > { %1706 = vmatpush3.bf16.msra.mxu1 %v1826_v24  ;;  %1730 = vmatpush3.bf16.msra.mxu0 %v1827_v25 }
  0x37   : > { %1707 = vmatprep.subr.bf16.mxu1 %v1828_v26  ;;  %1731 = vmatprep.subr.bf16.mxu0 %v1829_v27 }
  0x3a   : > { %1708 = vmatpush3.bf16.msra.mxu1 %v1828_v26  ;;  %1732 = vmatpush3.bf16.msra.mxu0 %v1829_v27 }
  0x3b   : > { %1749 = vmatprep.subr.mxu1 %v1838_v28 }
  0x3c   : > { %1670 = vmatmul.mubr.msk.bf16.gmra.mxu1 %vm350_vm0, %v1923_v9  ;;  %1694 = vmatmul.mubr.msk.bf16.gmra.mxu0 %vm350_vm0, %v1923_v9 }
  0x3d   : > { %1673 = vmatprep.mubr.msk.bf16.mxu1 %vm350_vm0, %v1935_v13  ;;  %1697 = vmatprep.mubr.msk.bf16.mxu0 %vm350_vm0, %v1935_v13 }
  0x44   : > { %1674 = vmatmul.mubr.msk.bf16.gmra.mxu1 %vm350_vm0, %v1955_v17  ;;  %1698 = vmatmul.mubr.msk.bf16.gmra.mxu0 %vm350_vm0, %v1955_v17 }
  0x45   : > { %1709 = vmatprep.mubr.msk.bf16.mxu1 %vm350_vm0, %v1904_v4  ;;  %1733 = vmatprep.mubr.msk.bf16.mxu0 %vm350_vm0, %v1904_v4 }
  0x4c   : > { %1710 = vmatmul.mubr.msk.bf16.vlgmr.msra.gmra.mxu1 %vm350_vm0, %v1920_v8  ;;  %1734 = vmatmul.mubr.msk.bf16.vlgmr.msra.gmra.mxu0 %vm350_vm0, %v1920_v8 }
  0x4d   : > { %1713 = vmatprep.mubr.msk.bf16.mxu1 %vm350_vm0, %v1932_v12  ;;  %1737 = vmatprep.mubr.msk.bf16.mxu0 %vm350_vm0, %v1932_v12 }
  0x4e   : > { %1750 = vmatpush3.msra.mxu1 %v1277_v29 }
  0x4f   : > { %1751 = vmatprep.subr.mxu1 %v1838_v28 }
  0x50   : > { %1752 = vmatpush3.msra.mxu1 %v1276_v30 }
  0x51   : > { %1753 = vmatprep.subr.mxu1 %v1838_v28 }
  0x52   : > { %1754 = vmatpush3.msra.mxu1 %v1275_v31 }
  0x53   : > { %1755 = vmatprep.subr.mxu1 %v1838_v28 }
  0x54   : > { %1714 = vmatmul.mubr.msk.bf16.gmra.mxu1 %vm350_vm0, %v1952_v16  ;;  %1738 = vmatmul.mubr.msk.bf16.gmra.mxu0 %vm350_vm0, %v1952_v16 }
  0x55   : > { %1717 = vmatprep.mubr.msk.bf16.mxu1 %vm350_vm0, %v1907_v5  ;;  %1741 = vmatprep.mubr.msk.bf16.mxu0 %vm350_vm0, %v1907_v5 }
  0x56   : > { %1756 = vmatpush3.msra.mxu1 %v1274_v32 }
  0x57   : > { %1757 = vmatprep.subr.mxu1 %v1838_v28 }
  0x58   : > { %1758 = vmatpush3.msra.mxu1 %v1273_v33 }
  0x59   : > { %1759 = vmatprep.subr.mxu1 %v1838_v28 }
  0x5a   : > { %1760 = vmatpush3.msra.mxu1 %v1272_v34 }
  0x5b   : > { %1761 = vmatprep.subr.mxu1 %v1838_v28 }
  0x5c   : > { %1718 = vmatmul.mubr.msk.bf16.gmra.mxu1 %vm350_vm0, %v1923_v9  ;;  %1742 = vmatmul.mubr.msk.bf16.gmra.mxu0 %vm350_vm0, %v1923_v9 }
  0x5d   : > { %1721 = vmatprep.mubr.msk.bf16.mxu1 %vm350_vm0, %v1935_v13  ;;  %1745 = vmatprep.mubr.msk.bf16.mxu0 %vm350_vm0, %v1935_v13 }
  0x5e   : > { %1762 = vmatpush3.msra.mxu1 %v1271_v35 }
  0x5f   : > { %1763 = vmatprep.subr.mxu1 %v1838_v28 }
  0x60   : > { %1764 = vmatpush3.msra.mxu1 %v1270_v36 }
  0x61   : > { %1765 = vmatprep.subr.mxu1 %v1838_v28 }
  0x62   : > { %1766 = vmatpush3.msra.mxu1 %v1269_v37 }
  0x63   : > { %1767 = vmatprep.subr.mxu1 %v1838_v28 }
  0x64   : > { %1722 = vmatmul.mubr.msk.bf16.gmra.mxu1 %vm350_vm0, %v1955_v17  ;;  %1746 = vmatmul.mubr.msk.bf16.gmra.mxu0 %vm350_vm0, %v1955_v17 }
  0x65   : > { %1768 = vmatpush3.msra.mxu1 %v1268_v38  ;;  %1781 = vmatprep.mubr.msk.f32.mxu1 %vm1839_vm1, %v1838_v28 }
  0x66   : > { %1769 = vmatprep.subr.mxu1 %v1838_v28 }
  0x67   : > { %1770 = vmatpush3.msra.mxu1 %v1267_v39 }
  0x68   : > { %1771 = vmatprep.subr.mxu1 %v1838_v28 }
  0x69   : > { %1772 = vmatpush3.msra.mxu1 %v1266_v40 }
  0x6a   : > { %1773 = vmatprep.subr.mxu1 %v1838_v28 }
  0x6b   : > { %1774 = vmatpush3.msra.mxu1 %v1265_v41 }
  0x6c   : > { %1775 = vmatprep.subr.mxu1 %v1838_v28 }
  0x6d   : > { %1776 = vmatpush3.msra.mxu1 %v1264_v42 }
  0x6e   : > { %1777 = vmatprep.subr.mxu1 %v1838_v28 }
  0x6f   : > { %1778 = vmatpush3.msra.mxu1 %v1263_v43 }
  0x70   : > { %1779 = vmatprep.subr.mxu1 %v1838_v28 }
  0x71   : > { %1780 = vmatpush3.msra.mxu1 %v1262_v44 }
  0xdc   : > { %v2103_v46 = vpop.f32.mrf.mxu0  ;;  %v1647_v47 = vpop.f32.mrf.mxu1 }
  0xdd   : > { %v482_v53 = vrot.slane %v1647_v47, 1  ;;  %v474_v26 = vrot.slane %v2103_v46, 1 }
  0xde   : > { %v2107_v49 = vpop.f32.mrf.mxu0  ;;  %v2109_v50 = vpop.f32.mrf.mxu1 }
  0xdf   : > { %v480_v59 = vrot.slane %v2109_v50, 1  ;;  %v472_v30 = vrot.slane %v2107_v49, 1 }
  0xe0   : > { %v1640_v51 = vpop.f32.mrf.mxu0  ;;  %v2111_v52 = vpop.f32.mrf.mxu1 }
  0xe1   : > { %v483_v54 = vrot.slane %v2111_v52, 1  ;;  %v475_v22 = vrot.slane %v1640_v51, 1 }
  0xe2   : > { %v412_v55 = vpop.f32.mrf.mxu0  ;;  %v444_v56 = vpop.f32.mrf.mxu1 }
  0xe3   : > { %v481_v57 = vrot.slane %v444_v56, 1  ;;  %v2117_v58 = vsel %vm490_vm2, %v482_v53, %v483_v54  ;;  %v473_v23 = vrot.slane %v412_v55, 1  ;;  %v503_v37 = vsel %vm490_vm2, %v474_v26, %v475_v22 }
  0xe4   : > { %v2120_v60 = vpop.f32.mrf.mxu0  ;;  %v2122_v61 = vpop.f32.mrf.mxu1 }
  0xe5   : > { %v2128_v0 = vsel %vm490_vm2, %v480_v59, %v481_v57  ;;  %v2132_v1 = vsel %vm490_vm2, %v481_v57, %v482_v53  ;;  %v478_v34 = vrot.slane %v2120_v60, 1  ;;  %v486_v35 = vrot.slane %v2122_v61, 1 }
  0xe6   : > { %v425_v62 = vpop.f32.mrf.mxu0  ;;  %v2124_v63 = vpop.f32.mrf.mxu1  ;;  %v505_v39 = vsel %vm490_vm2, %v472_v30, %v473_v23  ;;  %v504_v41 = vsel %vm490_vm2, %v473_v23, %v474_v26 }
  0xe7   : > { %v476_v27 = vrot.slane %v425_v62, 1  ;;  %v484_v28 = vrot.slane %v2124_v63, 1 }
  0xe8   : > { %v1644_v2 = vpop.f32.mrf.mxu0  ;;  %v1652_v3 = vpop.f32.mrf.mxu1 }
  0xe9   : > { %v479_v29 = vrot.slane %v1644_v2, 1  ;;  %v487_v31 = vrot.slane %v1652_v3, 1  ;;  %v502_v44 = vsel %vm490_vm2, %v475_v22, %v476_v27  ;;  %v2188_v47 = vsel %vm490_vm2, %v483_v54, %v484_v28 }
  0xea   : > { %v428_v4 = vpop.f32.mrf.mxu0  ;;  %v2134_v5 = vpop.f32.mrf.mxu1 }
  0xeb   : > { %v477_v36 = vrot.slane %v428_v4, 1  ;;  %v485_v38 = vrot.slane %v2134_v5, 1  ;;  %v499_v46 = vsel %vm490_vm2, %v478_v34, %v479_v29  ;;  %v498_v50 = vsel %vm490_vm2, %v479_v29, %v480_v59 }
  0xec   : > { %v1663_v6 = vpop.f32.mrf.mxu1  ;;  %v2136_v7 = vpop.f32.mrf.mxu0  ;;  %v2195_v53 = vsel %vm490_vm2, %v486_v35, %v487_v31  ;;  %v2199_v55 = vsel %vm490_vm2, %v487_v31, %v472_v30 }
  0xed   : > { %v760_v49 = vrot.slane %v2136_v7, 2  ;;  %v574_v56 = vadd.f32 %v1663_v6, %v503_v37  ;;  %v501_v54 = vsel %vm490_vm2, %v476_v27, %v477_v36  ;;  %v500_v62 = vsel %vm490_vm2, %v477_v36, %v478_v34 }
  0xee   : > { %v565_v8 = vpop.f32.mrf.mxu1  ;;  %v2138_v9 = vpop.f32.mrf.mxu0  ;;  %v493_v3 = vsel %vm490_vm2, %v484_v28, %v485_v38  ;;  %v2220_v7 = vsel %vm490_vm2, %v485_v38, %v486_v35 }
  0xef   : > { %v758_v57 = vrot.slane %v2138_v9, 2  ;;  %v566_v4 = vadd.f32 %v565_v8, %v505_v39 }
  0xf0   : > { %v1664_v10 = vpop.f32.mrf.mxu1  ;;  %v2140_v11 = vpop.f32.mrf.mxu0 }
  0xf1   : > { %v761_v40 = vrot.slane %v2140_v11, 2  ;;  %v577_v11 = vadd.f32 %v1664_v10, %v502_v44 }
  0xf2   : > { %v568_v12 = vpop.f32.mrf.mxu1  ;;  %v698_v13 = vpop.f32.mrf.mxu0 }
  0xf3   : > { %v759_v45 = vrot.slane %v698_v13, 2  ;;  %v787_v59 = vsel %vm774_vm3, %v760_v49, %v761_v40  ;;  %v569_v5 = vadd.f32 %v568_v12, %v504_v41 }
  0xf4   : > { %v1667_v14 = vpop.f32.mrf.mxu1  ;;  %v2142_v15 = vpop.f32.mrf.mxu0  ;;  %v2226_v12 = vadd.f32 %v787_v59, %v574_v56 }
  0xf5   : > { %v789_v6 = vsel %vm774_vm3, %v758_v57, %v759_v45  ;;  %v788_v13 = vsel %vm774_vm3, %v759_v45, %v760_v49  ;;  %v590_v23 = vadd.f32 %v1667_v14, %v499_v46 }
  0xf6   : > { %v2144_v16 = vpop.f32.mrf.mxu1  ;;  %v2146_v17 = vpop.f32.mrf.mxu0  ;;  %v2231_v28 = vadd.f32 %v789_v6, %v566_v4  ;;  %v2237_v31 = vadd.f32 %v788_v13, %v569_v5 }
  0xf7   : > { %v762_v60 = vrot.slane %v2146_v17, 2  ;;  %v764_v17 = vrot.slane %v2142_v15, 2  ;;  %v582_v14 = vadd.f32 %v2144_v16, %v501_v54 }
  0xf8   : > { %v2148_v18 = vpop.f32.mrf.mxu1  ;;  %v2150_v19 = vpop.f32.mrf.mxu0 }
  0xf9   : > { %v765_v61 = vrot.slane %v2150_v19, 2  ;;  %v786_v26 = vsel %vm774_vm3, %v761_v40, %v762_v60  ;;  %v593_v34 = vadd.f32 %v2148_v18, %v498_v50 }
  0xfa   : > { %v2152_v20 = vpop.f32.mrf.mxu1  ;;  %v2154_v21 = vpop.f32.mrf.mxu0  ;;  %v2242_v35 = vadd.f32 %v786_v26, %v577_v11 }
  0xfb   : > { %v763_v19 = vrot.slane %v2154_v21, 2  ;;  %v783_v10 = vsel %vm774_vm3, %v764_v17, %v765_v61 }
  0xfc   : > { %v2156_v24 = vpop.f32.mrf.mxu1  ;;  %v2158_v25 = vpop.f32.mrf.mxu0  ;;  %v2250_v41 = vadd.f32 %v783_v10, %v590_v23 }
  0xfd   : > { %v784_v36 = vsel %vm774_vm3, %v763_v19, %v764_v17  ;;  %v785_v37 = vsel %vm774_vm3, %v762_v60, %v763_v19  ;;  %v768_v38 = vrot.slane %v2158_v25, 2  ;;  %v606_v16 = vadd.f32 %v2156_v24, %v2117_v58 }
  0xfe   : > { %v2164_v32 = vpop.f32.mrf.mxu1  ;;  %v2166_v33 = vpop.f32.mrf.mxu0  ;;  %v2261_v50 = vadd.f32 %v785_v37, %v582_v14 }
  0xff   : > { %v766_v27 = vrot.slane %v2166_v33, 2  ;;  %v585_v33 = vadd.f32 %v2152_v20, %v500_v62  ;;  %v598_v58 = vadd.f32 %v2164_v32, %v2128_v0 }
 0x100   : > { %v2178_v42 = vpop.f32.mrf.mxu1  ;;  %v2180_v43 = vpop.f32.mrf.mxu0 }
 0x101   : > { %v769_v29 = vrot.slane %v2180_v43, 2  ;;  %v782_v18 = vsel %vm774_vm3, %v765_v61, %v766_v27 }
 0x102   : > { %v600_v51 = vpop.f32.mrf.mxu1  ;;  %v730_v52 = vpop.f32.mrf.mxu0  ;;  %v2269_v56 = vadd.f32 %v782_v18, %v593_v34 }
 0x103   : > { %v767_v15 = vrot.slane %v730_v52, 2  ;;  %v779_v43 = vsel %vm774_vm3, %v768_v38, %v769_v29  ;;  %v601_v44 = vadd.f32 %v600_v51, %v2132_v1  ;;  %v2263_v52 = vadd.f32 %v784_v36, %v585_v33 }
 0x104   : > { %v1675_v63 = vpop.f32.mrf.mxu1  ;;  %v2210_v2 = vpop.f32.mrf.mxu0  ;;  %v609_v1 = vadd.f32 %v2178_v42, %v2188_v47  ;;  %v2278_v61 = vadd.f32 %v779_v43, %v606_v16  ;;  %v2325_v16 = vld [vmem:[%s2482_s3] sm:$0xff] }
 0x105   : > { %v781_v25 = vsel %vm774_vm3, %v766_v27, %v767_v15  ;;  %v780_v24 = vsel %vm774_vm3, %v767_v15, %v768_v38  ;;  %v772_v51 = vrot.slane %v2210_v2, 2  ;;  %v622_v0 = vadd.f32 %v1675_v63, %v2195_v53 }
 0x106   : > { %v613_v22 = vpop.f32.mrf.mxu1  ;;  %v743_v8 = vpop.f32.mrf.mxu0  ;;  %v2280_v62 = vadd.f32 %v781_v25, %v598_v58  ;;  %v2285_v4 = vadd.f32 %v780_v24, %v601_v44 }
 0x107   : > { %v770_v20 = vrot.slane %v743_v8, 2  ;;  %v614_v5 = vadd.f32 %v613_v22, %v493_v3 }
 0x108   : > { %v1676_v30 = vpop.f32.mrf.mxu1  ;;  %v1700_v21 = vpop.f32.mrf.mxu0 }
 0x109   : > { %v773_v45 = vrot.slane %v1700_v21, 2  ;;  %v778_v32 = vsel %vm774_vm3, %v769_v29, %v770_v20  ;;  %v625_v42 = vadd.f32 %v1676_v30, %v2199_v55 }
 0x10a   : > { %v616_v39 = vpop.f32.mrf.mxu1  ;;  %v746_v40 = vpop.f32.mrf.mxu0  ;;  %v2294_v17 = vadd.f32 %v778_v32, %v609_v1 }
 0x10b   : > { %v771_v54 = vrot.slane %v746_v40, 2  ;;  %v775_v47 = vsel %vm774_vm3, %v772_v51, %v773_v45  ;;  %v790_v11 = vsel %vm774_vm3, %v773_v45, %v758_v57  ;;  %v617_v19 = vadd.f32 %v616_v39, %v2220_v7 }
 0x10c   : > { %v1711_v46 = vpop.f32.mrf.mxu1  ;;  %v1735_v49 = vpop.f32.mrf.mxu0  ;;  %v2302_v27 = vadd.f32 %v775_v47, %v622_v0  ;;  %v2304_v10 = vadd.f32 %v790_v11, %v625_v42 }
 0x10d   : > { %v939_v13 = vrot.slane %v1711_v46, 3  ;;  %v777_v55 = vsel %vm774_vm3, %v770_v20, %v771_v54  ;;  %v1118_v3 = vrot.slane %v1735_v49, 4  ;;  %v776_v7 = vsel %vm774_vm3, %v771_v54, %v772_v51 }
 0x10e   : > { %v2274_v60 = vpop.f32.mrf.mxu1  ;;  %v2276_v59 = vpop.f32.mrf.mxu0  ;;  %v2318_v36 = vadd.f32 %v777_v55, %v614_v5  ;;  %v2338_v44 = vadd.f32 %v776_v7, %v617_v19 }
 0x10f   : > { %v937_v23 = vrot.slane %v2274_v60, 3  ;;  %v1116_v21 = vrot.slane %v2276_v59, 4 }
 0x110   : > { %v1712_v2 = vpop.f32.mrf.mxu1  ;;  %v1736_v6 = vpop.f32.mrf.mxu0 }
 0x111   : > { %v940_v53 = vrot.slane %v1712_v2, 3  ;;  %v1119_v63 = vrot.slane %v1736_v6, 4 }
 0x112   : > { %v877_v22 = vpop.f32.mrf.mxu1  ;;  %v1056_v8 = vpop.f32.mrf.mxu0 }
 0x113   : > { %v966_v9 = vsel %vm953_vm4, %v939_v13, %v940_v53  ;;  %v938_v26 = vrot.slane %v877_v22, 3  ;;  %v1117_v57 = vrot.slane %v1056_v8, 4  ;;  %v1145_v14 = vsel %vm1132_vm5, %v1118_v3, %v1119_v63 }
 0x114   : > { %v972_v29 = vadd.f32 %v966_v9, %v2226_v12  ;;  %v1715_v15 = vpop.f32.mrf.mxu1  ;;  %v1739_v30 = vpop.f32.mrf.mxu0 }
 0x115   : > { %v967_v34 = vsel %vm953_vm4, %v938_v26, %v939_v13  ;;  %v968_v33 = vsel %vm953_vm4, %v937_v23, %v938_v26  ;;  %v1146_v18 = vsel %vm1132_vm5, %v1117_v57, %v1118_v3  ;;  %v1147_v20 = vsel %vm1132_vm5, %v1116_v21, %v1117_v57 }
 0x116   : > { %v1151_v37 = vadd.f32 %v1145_v14, %v972_v29  ;;  %v970_v12 = vadd.f32 %v968_v33, %v2231_v28  ;;  %v971_v38 = vadd.f32 %v967_v34, %v2237_v31  ;;  %v890_v39 = vpop.f32.mrf.mxu1  ;;  %v1069_v40 = vpop.f32.mrf.mxu0  ;;  %v2336_v28 = vld [vmem:[%s2482_s3 + $0x8] sm:$0xff]  ;;  %v943_v46 = vrot.slane %v1715_v15, 3 }
 0x117   : > { %v941_v31 = vrot.slane %v890_v39, 3  ;;  %v1120_v43 = vrot.slane %v1069_v40, 4  ;;  %v1122_v24 = vrot.slane %v1739_v30, 4 }
 0x118   : > { %v1149_v25 = vadd.f32 %v1147_v20, %v970_v12  ;;  %v1150_v45 = vadd.f32 %v1146_v18, %v971_v38  ;;  %v1716_v49 = vpop.f32.mrf.mxu1  ;;  %v1740_v58 = vpop.f32.mrf.mxu0  ;;  %v1169_v0 = vadd.f32 %v2325_v16, %v1151_v37 }
 0x119   : > { %v965_v1 = vsel %vm953_vm4, %v940_v53, %v941_v31  ;;  %v944_v51 = vrot.slane %v1716_v49, 3  ;;  %v1123_v54 = vrot.slane %v1740_v58, 4  ;;  %v1144_v6 = vsel %vm1132_vm5, %v1119_v63, %v1120_v43 }
 0x11a   : > { %v1167_v32 = vadd.f32 %v2325_v16, %v1149_v25  ;;  %v1168_v5 = vadd.f32 %v2336_v28, %v1150_v45  ;;  %v973_v42 = vadd.f32 %v965_v1, %v2242_v35  ;;  %v893_v47 = vpop.f32.mrf.mxu1  ;;  %v1072_v2 = vpop.f32.mrf.mxu0 }
 0x11b   : > { %v962_v11 = vsel %vm953_vm4, %v943_v46, %v944_v51  ;;  %v942_v13 = vrot.slane %v893_v47, 3  ;;  %v1121_v53 = vrot.slane %v1072_v2, 4  ;;  %v1141_v22 = vsel %vm1132_vm5, %v1122_v24, %v1123_v54 }
 0x11c   : > { %v1183_v19 = vmax.f32 %v1167_v32, %v1168_v5  ;;  %v1152_v55 = vadd.f32 %v1144_v6, %v973_v42  ;;  %v976_v3 = vadd.f32 %v962_v11, %v2250_v41  ;;  %v1719_v8 = vpop.f32.mrf.mxu1  ;;  %v1743_v9 = vpop.f32.mrf.mxu0 }
 0x11d   : > { %v963_v35 = vsel %vm953_vm4, %v942_v13, %v943_v46  ;;  %v964_v63 = vsel %vm953_vm4, %v941_v31, %v942_v13  ;;  %v1142_v26 = vsel %vm1132_vm5, %v1121_v53, %v1122_v24  ;;  %v1143_v57 = vsel %vm1132_vm5, %v1120_v43, %v1121_v53 }
 0x11e   : > { %v1184_v7 = vrot.slane %v1183_v19, 4  ;;  %v1170_v41 = vadd.f32 %v2336_v28, %v1152_v55  ;;  %v1155_v29 = vadd.f32 %v1141_v22, %v976_v3  ;;  %v974_v15 = vadd.f32 %v964_v63, %v2261_v50  ;;  %v906_v30 = vpop.f32.mrf.mxu1  ;;  %v1085_v14 = vpop.f32.mrf.mxu0 }
 0x11f   : > { %v975_v34 = vadd.f32 %v963_v35, %v2263_v52  ;;  %v947_v33 = vrot.slane %v1719_v8, 3  ;;  %v1126_v37 = vrot.slane %v1743_v9, 4  ;;  %v945_v12 = vrot.slane %v906_v30, 3  ;;  %v2391_v9 = vld [vmem:[%s2481_s2] ss:$0 sm:$0xff] }
 0x120   : > { %v1185_v38 = vmax.f32 %v1183_v19, %v1184_v7  ;;  %v1190_v39 = vmax.f32 %v1169_v0, %v1170_v41  ;;  %v1173_v40 = vadd.f32 %v2325_v16, %v1155_v29  ;;  %v1153_v18 = vadd.f32 %v1143_v57, %v974_v15  ;;  %v2365_v20 = vpop.f32.mrf.mxu1  ;;  %v2367_v31 = vpop.f32.mrf.mxu0 }
 0x121   : > { %v1154_v43 = vadd.f32 %v1142_v26, %v975_v34  ;;  %v961_v50 = vsel %vm953_vm4, %v944_v51, %v945_v12  ;;  %v1124_v25 = vrot.slane %v1085_v14, 4  ;;  %v948_v45 = vrot.slane %v2365_v20, 3 }
 0x122   : > { %v1186_v52 = vrot.slane %v1185_v38, 2  ;;  %v1191_v46 = vrot.slane %v1190_v39, 4  ;;  %v1171_v49 = vadd.f32 %v2325_v16, %v1153_v18  ;;  %v977_v58 = vadd.f32 %v961_v50, %v2269_v56  ;;  %v909_v24 = vpop.f32.mrf.mxu1  ;;  %v1088_v1 = vpop.f32.mrf.mxu0 }
 0x123   : > { %v1172_v0 = vadd.f32 %v2336_v28, %v1154_v43  ;;  %v1140_v32 = vsel %vm1132_vm5, %v1123_v54, %v1124_v25  ;;  %v958_v5 = vsel %vm953_vm4, %v947_v33, %v948_v45  ;;  %v1127_v51 = vrot.slane %v2367_v31, 4 }
 0x124   : > { %v1187_v42 = vmax.f32 %v1185_v38, %v1186_v52  ;;  %v1192_v47 = vmax.f32 %v1190_v39, %v1191_v46  ;;  %v1156_v2 = vadd.f32 %v1140_v32, %v977_v58  ;;  %v980_v6 = vadd.f32 %v958_v5, %v2278_v61  ;;  %v2381_v11 = vpop.f32.mrf.mxu1  ;;  %v2385_v55 = vpop.f32.mrf.mxu0 }
 0x125   : > { %v1197_v56 = vmax.f32 %v1171_v49, %v1172_v0  ;;  %v1137_v13 = vsel %vm1132_vm5, %v1126_v37, %v1127_v51  ;;  %v946_v53 = vrot.slane %v909_v24, 3  ;;  %v1125_v19 = vrot.slane %v1088_v1, 4 }
 0x126   : > { %v1188_v54 = vrot.slane %v1187_v42, 1  ;;  %v1193_v3 = vrot.slane %v1192_v47, 2  ;;  %v1174_v22 = vadd.f32 %v2336_v28, %v1156_v2  ;;  %v1159_v8 = vadd.f32 %v1137_v13, %v980_v6  ;;  %v2399_v57 = vpop.f32.mrf.mxu1  ;;  %v2406_v38 = vpop.f32.mrf.mxu0 }
 0x127   : > { %v1198_v61 = vrot.slane %v1197_v56, 4  ;;  %v959_v35 = vsel %vm953_vm4, %v946_v53, %v947_v33  ;;  %v960_v63 = vsel %vm953_vm4, %v945_v12, %v946_v53  ;;  %v1138_v26 = vsel %vm1132_vm5, %v1125_v19, %v1126_v37 }
 0x128   : > { %v1189_v7 = vmax.f32 %v1187_v42, %v1188_v54  ;;  %v1194_v41 = vmax.f32 %v1192_v47, %v1193_v3  ;;  %v1204_v29 = vmax.f32 %v1173_v40, %v1174_v22  ;;  %v1177_v15 = vadd.f32 %v2325_v16, %v1159_v8  ;;  %v1748_v1 = vpop.f32.mrf.mxu0 }
 0x129   : > { %v1199_v30 = vmax.f32 %v1197_v56, %v1198_v61  ;;  %v978_v14 = vadd.f32 %v960_v63, %v2280_v62  ;;  %v979_v34 = vadd.f32 %v959_v35, %v2285_v4  ;;  %v1139_v33 = vsel %vm1132_vm5, %v1124_v25, %v1125_v19  ;;  %v1724_v62 = vpop.f32.mrf.mxu1 }
 0x12a   : > { %v2409_v12 = vadd.f32 %v2391_v9, %v1189_v7  ;;  %v1195_v37 = vrot.slane %v1194_v41, 1  ;;  %v1205_v39 = vrot.slane %v1204_v29, 4  ;;  %v951_v18 = vrot.slane %v2381_v11, 3  ;;  %v1104_v8 = vpop.f32.mrf.mxu0 }
 0x12b   : > { %v1200_v40 = vrot.slane %v1199_v30, 2  ;;  %v1157_v20 = vadd.f32 %v1139_v33, %v978_v14  ;;  %v1158_v31 = vadd.f32 %v1138_v26, %v979_v34  ;;  %v1130_v43 = vrot.slane %v2385_v55, 4  ;;  %v925_v54 = vpop.f32.mrf.mxu1 }
 0x12c   : > { %v1254_v4 = vmax.f32 %v2409_v12, 0.0  ;;  %v1196_v50 = vmax.f32 %v1194_v41, %v1195_v37  ;;  %v1206_v52 = vmax.f32 %v1204_v29, %v1205_v39  ;;  %v949_v25 = vrot.slane %v2399_v57, 3 }
 0x12d   : > { %v1201_v46 = vmax.f32 %v1199_v30, %v1200_v40  ;;  %v1175_v49 = vadd.f32 %v2325_v16, %v1157_v20  ;;  %v1176_v58 = vadd.f32 %v2336_v28, %v1158_v31  ;;  %v1128_v24 = vrot.slane %v2406_v38, 4 }
 0x12e   : > { %v1247_v0 = vadd.f32 %v2391_v9, %v1196_v50  ;;  %v1207_v32 = vrot.slane %v1206_v52, 2  ;;  %v957_v5 = vsel %vm953_vm4, %v948_v45, %v949_v25  ;;  %v952_v42 = vrot.slane %v1724_v62, 3 }
 0x12f   : > { %v1202_v47 = vrot.slane %v1201_v46, 1  ;;  %v1211_v2 = vmax.f32 %v1175_v49, %v1176_v58  ;;  %v981_v6 = vadd.f32 %v957_v5, %v2294_v17  ;;  %v1136_v11 = vsel %vm1132_vm5, %v1127_v51, %v1128_v24 }
 0x130   : > { %v1255_v56 = vmax.f32 %v1247_v0, 0.0  ;;  %v1208_v13 = vmax.f32 %v1206_v52, %v1207_v32  ;;  %v954_v53 = vsel %vm953_vm4, %v951_v18, %v952_v42  ;;  %v969_v19 = vsel %vm953_vm4, %v952_v42, %v937_v23 }
 0x131   : > { %v1203_v45 = vmax.f32 %v1201_v46, %v1202_v47  ;;  %v1212_v3 = vrot.slane %v1211_v2, 4  ;;  %v1160_v22 = vadd.f32 %v1136_v11, %v981_v6  ;;  %v984_v17 = vadd.f32 %v954_v53, %v2302_v27 }
 0x132   : > { %v1293_v51 = vrot.slane %v1255_v56, 7  ;;  %v1209_v61 = vrot.slane %v1208_v13, 1  ;;  %v985_v35 = vadd.f32 %v969_v19, %v2304_v10  ;;  %v1131_v63 = vrot.slane %v1748_v1, 4 }
 0x133   : > { %v1248_v60 = vadd.f32 %v2391_v9, %v1203_v45  ;;  %v1213_v26 = vmax.f32 %v1211_v2, %v1212_v3  ;;  %v1178_v23 = vadd.f32 %v2336_v28, %v1160_v22  ;;  %v950_v57 = vrot.slane %v925_v54, 3 }
 0x134   : > { %v1210_v7 = vmax.f32 %v1208_v13, %v1209_v61  ;;  %v1133_v27 = vsel %vm1132_vm5, %v1130_v43, %v1131_v63  ;;  %v1148_v41 = vsel %vm1132_vm5, %v1131_v63, %v1116_v21  ;;  %v1129_v10 = vrot.slane %v1104_v8, 4 }
 0x135   : > { %v1256_v29 = vmax.f32 %v1248_v60, 0.0  ;;  %v1214_v30 = vrot.slane %v1213_v26, 2  ;;  %v1218_v14 = vmax.f32 %v1177_v15, %v1178_v23  ;;  %v1163_v34 = vadd.f32 %v1133_v27, %v984_v17 }
 0x136   : > { %v1249_v33 = vadd.f32 %v2391_v9, %v1210_v7  ;;  %v1164_v38 = vadd.f32 %v1148_v41, %v985_v35  ;;  %v955_v37 = vsel %vm953_vm4, %v950_v57, %v951_v18  ;;  %v956_v39 = vsel %vm953_vm4, %v949_v25, %v950_v57 }
 0x137   : > { %v1296_v40 = vrot.slane %v1256_v29, 6  ;;  %v1215_v20 = vmax.f32 %v1213_v26, %v1214_v30  ;;  %v1219_v59 = vrot.slane %v1218_v14, 4  ;;  %v1181_v31 = vadd.f32 %v2325_v16, %v1163_v34  ;;  %v1549_v29 = vld [vmem:[%s2484_s5] ss:$0 sm:$0xff] }
 0x138   : > { %v1257_v21 = vmax.f32 %v1249_v33, 0.0  ;;  %v1182_v62 = vadd.f32 %v2336_v28, %v1164_v38  ;;  %v982_v15 = vadd.f32 %v956_v39, %v2318_v36  ;;  %v983_v50 = vadd.f32 %v955_v37, %v2338_v44 }
 0x139   : > { %v1216_v52 = vrot.slane %v1215_v20, 1  ;;  %v1220_v46 = vmax.f32 %v1218_v14, %v1219_v59  ;;  %v1134_v18 = vsel %vm1132_vm5, %v1129_v10, %v1130_v43  ;;  %v1135_v25 = vsel %vm1132_vm5, %v1128_v24, %v1129_v10 }
 0x13a   : > { %v1299_v49 = vrot.slane %v1257_v21, 5  ;;  %v1232_v58 = vmax.f32 %v1181_v31, %v1182_v62  ;;  %v1161_v1 = vadd.f32 %v1135_v25, %v982_v15  ;;  %v1162_v0 = vadd.f32 %v1134_v18, %v983_v50 }
 0x13b   : > { %v1217_v32 = vmax.f32 %v1215_v20, %v1216_v52  ;;  %v1221_v5 = vrot.slane %v1220_v46, 2  ;;  %v1295_v36 = vsel %vm1294_vm6, %v1293_v51, %v1254_v4 }
 0x13c   : > { %v1233_v44 = vrot.slane %v1232_v58, 4  ;;  %v1179_v42 = vadd.f32 %v2325_v16, %v1161_v1  ;;  %v1180_v55 = vadd.f32 %v2336_v28, %v1162_v0  ;;  %v1298_v43 = vsel %vm1297_vm7, %v1296_v40, %v1295_v36 }
 0x13d   : > { %v1222_v47 = vmax.f32 %v1220_v46, %v1221_v5  ;;  %v1250_v48 = vadd.f32 %v2391_v9, %v1217_v32  ;;  %v1301_v24 = vsel %vm1300_vm8, %v1299_v49, %v1298_v43 }
 0x13e   : > { %v1234_v2 = vmax.f32 %v1232_v58, %v1233_v44  ;;  %v1225_v6 = vmax.f32 %v1179_v42, %v1180_v55 }
 0x13f   : > { %v1223_v11 = vrot.slane %v1222_v47, 1  ;;  %v1258_v56 = vmax.f32 %v1250_v48, 0.0 }
 0x140   : > { %v1235_v13 = vrot.slane %v1234_v2, 2  ;;  %v1226_v12 = vrot.slane %v1225_v6, 4 }
 0x141   : > { %v1224_v4 = vmax.f32 %v1222_v47, %v1223_v11  ;;  %v1302_v53 = vrot.slane %v1258_v56, 4 }
 0x142   : > { %v1236_v19 = vmax.f32 %v1234_v2, %v1235_v13  ;;  %v1227_v16 = vmax.f32 %v1225_v6, %v1226_v12 }
 0x143   : > { %v1251_v28 = vadd.f32 %v2391_v9, %v1224_v4  ;;  %v1304_v54 = vsel %vm1303_vm9, %v1302_v53, %v1301_v24 }
 0x144   : > { %v1228_v45 = vrot.slane %v1227_v16, 2  ;;  %v1237_v3 = vrot.slane %v1236_v19, 1 }
 0x145   : > { %v1259_v22 = vmax.f32 %v1251_v28, 0.0 }
 0x146   : > { %v1229_v17 = vmax.f32 %v1227_v16, %v1228_v45  ;;  %v1238_v8 = vmax.f32 %v1236_v19, %v1237_v3 }
 0x147   : > { %v1305_v51 = vrot.slane %v1259_v22, 3 }
 0x148   : > { %v1230_v61 = vrot.slane %v1229_v17, 1  ;;  %v1253_v35 = vadd.f32 %v2391_v9, %v1238_v8 }
 0x149   : > { %v1307_v63 = vsel %vm1306_vm10, %v1305_v51, %v1304_v54 }
 0x14a   : > { %v1231_v60 = vmax.f32 %v1229_v17, %v1230_v61  ;;  %v1261_v23 = vmax.f32 %v1253_v35, 0.0 }
 0x14c   : > { %v1252_v26 = vadd.f32 %v2391_v9, %v1231_v60  ;;  %v1311_v27 = vrot.slane %v1261_v23, 1 }
 0x14e   : > { %v1260_v57 = vmax.f32 %v1252_v26, 0.0 }
 0x150   : > { %v1308_v7 = vrot.slane %v1260_v57, 2 }
 0x152   : > { %v1310_v41 = vsel %vm1309_vm11, %v1308_v7, %v1307_v63 }
 0x153   : > { %v1313_v10 = vsel %vm1312_vm12, %v1311_v27, %v1310_v41 }
 0x154   : > { %1782 = vmatmul.mubr.f32.vlgmr.msra.gmra.mxu1 %v1313_v10 }
 0x214   : > { %v1381_v9 = vpop.f32.mrf.mxu1 }
 0x215   : > { %v1382_v30 = vadd.f32 %v1549_v29, %v1381_v9 }
 0x216   : > { %v1783_v14 = vpop.f32.mrf.mxu1 }
 0x217   : > { %1386 = vst.msk [vmem:[%s251_s23] sm:$0xff] %vm1385_vm13, %v1382_v30 }
 0x218 PF: > { %s16_s21 = sadd.s32 1, %s1836_s21  }
 0x219   : > { %p13_p5 = scmp.ge.s32.totalorder %s16_s21, 4  }
 0x21b   :  { %15 = sbr.rel (!%p13_p5) target bundleno = 1 (0x1), region = 78 }

</bundles_post_ra>
